<compile_context>
chip_gen: v7x
topology: tpu7x:2x2x1
jax: 0.10.0
libtpu: 0.0.40
codegen_flags: <defaults>
</compile_context>

<pallas_src>
import jax
import jax.numpy as jnp
from jax.experimental import pallas as pl
from jax.experimental.pallas import tpu as pltpu


def _mlp_kernel(x_t_ref, w1_t_ref, b1_ref, w2_ref, b2_ref, o_ref):
    """Shapes: x_t [F_in, TB] bf16, w1_t [H, F_in] bf16, b1 [H, 1] f32, w2 [H, 1] f32,
    b2 [1] f32 (SMEM), o [1, TB] f32."""
    # Hidden layer on the MXU: bf16 x bf16 with f32 accumulation, [H,F_in]@[F_in,TB] -> [H,TB].
    h = jnp.dot(w1_t_ref[...], x_t_ref[...], preferred_element_type=jnp.float32)
    h = jnp.maximum(h + b1_ref[...], 0.0)          # f32 bias broadcast over lanes + ReLU (VPU)
    # Output layer (N=1): f32 VPU multiply by the w2 column + XLU sublane reduce over H.
    # Scalar b2 (from SMEM) is folded directly into the store expression.
    out = jnp.sum(h * w2_ref[...], axis=0, keepdims=True) + b2_ref[0]
    o_ref[...] = out.astype(o_ref.dtype)


_LANE = 128
_TB = 32 * 1024                # batch (lane) tile for the pipelined path; multiple of 128
_MAX_SINGLE_BLOCK_B = _TB      # one tile: anything larger goes to the pipelined path


def simple_net_forward(x, w1, b1, w2, b2, *, tb=_TB, max_single_block_b=_MAX_SINGLE_BLOCK_B):
    """x: [B, 10]; w1: [10, 32] (in,out); b1: [32]; w2: [32, 1]; b2: [1]. Returns [B, 1] f32."""
    B, F_in = x.shape
    H = w1.shape[1]
    F_out = w2.shape[1]
    assert F_out == 1

    # Pad batch up to a lane-dense multiple (128 for the gridless path, tb for the tiled one).
    tile = _LANE if B <= max_single_block_b else tb
    Bp = ((B + tile - 1) // tile) * tile

    # One fused relayout: transpose + bf16 downcast + zero-pad (batch -> lanes).
    # Padded columns produce ReLU(b1)·w2 + b2 in the output; they are sliced off below.
    x_t = jnp.zeros((F_in, Bp), jnp.bfloat16).at[:, :B].set(x.T.astype(jnp.bfloat16))
    w1_t = w1.T.astype(jnp.bfloat16)               # [H, F_in], resident across grid steps
    b1_c = b1.reshape(H, 1).astype(jnp.float32)    # [H, 1]
    w2_c = w2.reshape(H, 1).astype(jnp.float32)    # [H, 1]
    b2_s = b2.reshape(1).astype(jnp.float32)       # scalar -> SMEM

    if Bp <= max_single_block_b:
        # <= one tile of work: gridless call, whole arrays resident in VMEM.
        out_t = pl.pallas_call(
            _mlp_kernel,
            out_shape=jax.ShapeDtypeStruct((1, Bp), jnp.float32),
            in_specs=[
                pl.BlockSpec(memory_space=pltpu.MemorySpace.VMEM),   # x_t
                pl.BlockSpec(memory_space=pltpu.MemorySpace.VMEM),   # w1_t
                pl.BlockSpec(memory_space=pltpu.MemorySpace.VMEM),   # b1
                pl.BlockSpec(memory_space=pltpu.MemorySpace.VMEM),   # w2
                pl.BlockSpec(memory_space=pltpu.MemorySpace.SMEM),   # b2 (scalar)
            ],
            out_specs=pl.BlockSpec(memory_space=pltpu.MemorySpace.VMEM),
        )(x_t, w1_t, b1_c, w2_c, b2_s)
    else:
        # Large batch: tile the lane (batch) axis; weights/biases stay resident across steps.
        out_t = pl.pallas_call(
            _mlp_kernel,
            out_shape=jax.ShapeDtypeStruct((1, Bp), jnp.float32),
            grid_spec=pltpu.PrefetchScalarGridSpec(
                num_scalar_prefetch=0,
                grid=(Bp // tb,),
                in_specs=[
                    pl.BlockSpec((F_in, tb), lambda i: (0, i)),      # stream x columns
                    pl.BlockSpec((H, F_in), lambda i: (0, 0)),       # resident weights
                    pl.BlockSpec((H, 1), lambda i: (0, 0)),
                    pl.BlockSpec((H, 1), lambda i: (0, 0)),
                    pl.BlockSpec(memory_space=pltpu.MemorySpace.SMEM),
                ],
                out_specs=pl.BlockSpec((1, tb), lambda i: (0, i)),
            ),
            compiler_params=pltpu.CompilerParams(
                dimension_semantics=("parallel",)),                  # shard batch tiles across TCs (v7x)
        )(x_t, w1_t, b1_c, w2_c, b2_s)

    # Back to the module's [B, 1] layout, dropping lane padding.
    return out_t[:, :B].T


if __name__ == "__main__":
    key = jax.random.PRNGKey(0)
    k_x, k_w1, k_b1, k_w2, k_b2 = jax.random.split(key, 5)

    B, F_in, H, F_out = 8, 10, 32, 1

    x = jax.random.normal(k_x, (B, F_in), dtype=jnp.float32)
    # Deterministic "kaiming-ish" init; weights stored as [in, out] (PyTorch weight.T).
    w1 = jax.random.normal(k_w1, (F_in, H), dtype=jnp.float32) * (1.0 / jnp.sqrt(F_in))
    b1 = jax.random.normal(k_b1, (H,), dtype=jnp.float32) * 0.01
    w2 = jax.random.normal(k_w2, (H, F_out), dtype=jnp.float32) * (1.0 / jnp.sqrt(H))
    b2 = jax.random.normal(k_b2, (F_out,), dtype=jnp.float32) * 0.01

    out = simple_net_forward(x, w1, b1, w2, b2)
    jax.block_until_ready(out)
    assert out.shape == (B, F_out)

    # Reference with the same bf16 input/weight rounding and f32 accumulation (matches kernel).
    xb = x.astype(jnp.bfloat16).astype(jnp.float32)
    w1b = w1.astype(jnp.bfloat16).astype(jnp.float32)
    ref_bf16 = jnp.maximum(xb @ w1b + b1[None, :], 0.0) @ w2 + b2[None, :]
    assert jnp.allclose(out, ref_bf16, atol=1e-4, rtol=1e-4)

    # Loose sanity check vs. the full-f32 reference (bf16 inputs => ~0.5% expected error).
    ref_f32 = jnp.maximum(x @ w1 + b1[None, :], 0.0) @ w2 + b2[None, :]
    assert jnp.allclose(out, ref_f32, atol=1e-1, rtol=1e-1)

    # Also exercise the batch-tiled (pipelined) path with a tiny tile so shapes stay small.
    B2 = 300
    x2 = jax.random.normal(k_x, (B2, F_in), dtype=jnp.float32)
    out2 = simple_net_forward(x2, w1, b1, w2, b2, tb=_LANE, max_single_block_b=_LANE)
    jax.block_until_ready(out2)
    xb2 = x2.astype(jnp.bfloat16).astype(jnp.float32)
    ref2 = jnp.maximum(xb2 @ w1b + b1[None, :], 0.0) @ w2 + b2[None, :]
    assert out2.shape == (B2, 1)
    assert jnp.allclose(out2, ref2, atol=1e-4, rtol=1e-4)

    print("KERNEL_OK")
</pallas_src>

<mosaic_0001>
module attributes {stable_mosaic.version = 11 : i64} {
  func.func @_mlp_kernel(%arg0: memref<10x128xbf16, #tpu.memory_space<vmem>>, %arg1: memref<32x10xbf16, #tpu.memory_space<vmem>>, %arg2: memref<32x1xf32, #tpu.memory_space<vmem>>, %arg3: memref<32x1xf32, #tpu.memory_space<vmem>>, %arg4: memref<1xf32, #tpu.memory_space<smem>>, %arg5: memref<1x128xf32, #tpu.memory_space<vmem>>) attributes {dimension_semantics = [], scalar_prefetch = 0 : i64, scratch_operands = 0 : i64, tpu.core_type = #tpu.core_type<tc>} {
    %c0 = arith.constant 0 : index
    %c0_0 = arith.constant 0 : index
    %0 = vector.load %arg1[%c0, %c0_0] : memref<32x10xbf16, #tpu.memory_space<vmem>>, vector<32x10xbf16>
    %c0_1 = arith.constant 0 : index
    %c0_2 = arith.constant 0 : index
    %1 = vector.load %arg0[%c0_1, %c0_2] : memref<10x128xbf16, #tpu.memory_space<vmem>>, vector<10x128xbf16>
    %cst = arith.constant dense<0.000000e+00> : vector<32x128xf32>
    %2 = tpu.matmul %0, %1, %cst {dimension_numbers = #tpu.dot_dimension_numbers<[1], [0], [0], [1], [0, 0, 1, 1], [], []>} : vector<32x10xbf16>, vector<10x128xbf16>, vector<32x128xf32> -> vector<32x128xf32>
    %c0_3 = arith.constant 0 : index
    %c0_4 = arith.constant 0 : index
    %3 = vector.load %arg2[%c0_3, %c0_4] : memref<32x1xf32, #tpu.memory_space<vmem>>, vector<32x1xf32>
    %4 = vector.broadcast %3 : vector<32x1xf32> to vector<32x128xf32>
    %5 = arith.addf %2, %4 : vector<32x128xf32>
    %cst_5 = arith.constant 0.000000e+00 : f32
    %6 = vector.broadcast %cst_5 : f32 to vector<32x128xf32>
    %7 = arith.maximumf %5, %6 : vector<32x128xf32>
    %c0_6 = arith.constant 0 : index
    %c0_7 = arith.constant 0 : index
    %8 = vector.load %arg3[%c0_6, %c0_7] : memref<32x1xf32, #tpu.memory_space<vmem>>, vector<32x1xf32>
    %9 = vector.broadcast %8 : vector<32x1xf32> to vector<32x128xf32>
    %10 = arith.mulf %7, %9 : vector<32x128xf32>
    %cst_8 = arith.constant dense<0.000000e+00> : vector<128xf32>
    %11 = vector.multi_reduction <add>, %10, %cst_8 [0] : vector<32x128xf32> to vector<128xf32>
    %12 = vector.shape_cast %11 : vector<128xf32> to vector<1x128xf32>
    %c0_9 = arith.constant 0 : index
    %13 = memref.load %arg4[%c0_9] : memref<1xf32, #tpu.memory_space<smem>>
    %14 = vector.broadcast %13 : f32 to vector<1x128xf32>
    %15 = arith.addf %12, %14 : vector<1x128xf32>
    %c0_10 = arith.constant 0 : index
    %c0_11 = arith.constant 0 : index
    %16 = vector.load %arg5[%c0_10, %c0_11] : memref<1x128xf32, #tpu.memory_space<vmem>>, vector<1x128xf32>
    tpu.vector_store %arg5[%c0_10, %c0_11], %15 {strides = array<i32>} : memref<1x128xf32, #tpu.memory_space<vmem>>, vector<1x128xf32>,
    return
  }
}

</mosaic_0001>

<bundles_post_ra>
// kernel: tpu_custom_call.1
= control target key start
LH: loop header
LB: loop body
LE: loop exit
PB: predicated region body
PF: predicated region fallthrough
CT: control target
= control target key end

     0   :  { %vm75_vm0 = vcmask 1044480   ;;  %vm68_vm1 = vcmask 80896   ;;  %v233_v6 = vmov 0   ;;  %s313_s0 = inlined_call_operand.vmem [shape: bf16[10,128], index: 0, kind: input, shape index: {}]   ;;  %s314_s1 = inlined_call_operand.vmem [shape: bf16[32,10], index: 1, kind: input, shape index: {}]   ;;  %s315_s2 = inlined_call_operand.vmem [shape: f32[32,1], index: 2, kind: input, shape index: {}]   ;;  %s316_s3 = inlined_call_operand.vmem [shape: f32[32,1], index: 3, kind: input, shape index: {}]   ;;  %s317_s4 = inlined_call_operand.<no memory space> [shape: f32[1], index: 4, kind: input, shape index: {}]   ;;  %s318_s5 = inlined_call_operand.hbm [shape: f32[1,128], index: 5, kind: output, shape index: {}]  }
   0x1   :  { %v206_v0 = vld [vmem:[%s313_s0] sm:$0x1f]   ;;  %v208_v3 = vld [vmem:[%s314_s1 + $0x8] sm:$0xff]   ;;  %v31_v5 = vld [vmem:[%s315_s2 + $0x10] sm:$0xff]  ;;  %204 = vset.pattern.permute.xlu0 %v233_v6  ;;  %205 = vset.pattern.permute.xlu1 %v233_v6 }
   0x2   :  { %v207_v1 = vld [vmem:[%s314_s1] sm:$0xff]   ;;  %201 = vmatprep.subr.msk.bf16.mxu0 %vm75_vm0, %v206_v0  ;;  %v77_v2 = vsel %vm75_vm0, %v206_v0, 0  ;;  %45 = vperm.xlu1 %205, %v31_v5   ;;  %v30_v7 = vld [vmem:[%s315_s2 + $0x8] sm:$0xff]  ;;  %v32_v8 = vld [vmem:[%s315_s2 + $0x18] sm:$0xff] }
   0x3   :  { %196 = vmatpush3.bf16.msra.mxu0 %v77_v2  ;;  %197 = vmatprep.mubr.msk.bf16.mxu0 %vm68_vm1, %v207_v1  ;;  %v29_v4 = vld [vmem:[%s315_s2] sm:$0xff] }
   0x4   :  { %35 = vperm.xlu0 %204, %v29_v4  }
   0x6   :  { %198 = vmatmul.mubr.msk.bf16.vlgmr.msra.gmra.mrb[0].mxu0 %vm68_vm1, %v208_v3 }
   0x7   :  { %11 = vsyncpa [#allocation4], 0  ;;  %50 = vperm.xlu1 %205, %v32_v8   ;;  %v132_v9 = vld [vmem:[%s316_s3] sm:$0xff]  ;;  %v133_v10 = vld [vmem:[%s316_s3 + $0x8] sm:$0xff]  ;;  %v170_v45 = vstv %s317_s4  ;;  %s234_s13 = smov [#allocation3]  }
   0x8   :  { %40 = vperm.xlu0 %204, %v30_v7   ;;  %v134_v11 = vld [vmem:[%s316_s3 + $0x10] sm:$0xff]  ;;  %v135_v12 = vld [vmem:[%s316_s3 + $0x18] sm:$0xff]  ;;  %s179_s14 = sshll.u32 %s234_s13, 4  ;;  %s180_s14 = int_to_ptr.vmem [resolvable:$true] %s179_s14 }
   0x9   :  { %s209_s15 = scalar_lea.vmem %s180_s14, 16  ;;  %s213_s16 = scalar_lea.vmem %s180_s14, 32 }
   0xa   :  { %p210_p0 = scmp.ne.s32.totalorder %s180_s14, %s209_s15  ;;  %p214_p1 = scmp.lt.s32.totalorder %s180_s14, %s180_s14 }
   0xb   :  { %143 = vperm.xlu1 %205, %v133_v10   ;;  %p215_p2 = scmp.lt.s32.totalorder %s213_s16, %s209_s15 }
   0xc   :  { %138 = vperm.xlu0 %204, %v132_v9  }
   0xd   :  { %p216_p3 = por %p215_p2, %p214_p1 }
   0xf   :  { %153 = vperm.xlu1 %205, %v135_v12   ;;  %p217_p4 = pnand %p216_p3, %p210_p0 }
  0x10   :  { %148 = vperm.xlu0 %204, %v134_v11  }
  0x81   :  { %v46_v14 = vpop.permute.xlu1 %45 }
  0x83   :  { %v36_v13 = vpop.permute.xlu0 %35 }
  0x86   :  { %v51_v16 = vpop.permute.xlu1 %50 }
  0x87   :  { %v41_v15 = vpop.permute.xlu0 %40 }
  0x8a   :  { %v144_v27 = vpop.permute.xlu1 %143 }
  0x8b   :  { %v139_v22 = vpop.permute.xlu0 %138 }
  0x8e   :  { %v154_v36 = vpop.permute.xlu1 %153 }
  0x8f   :  { %v149_v33 = vpop.permute.xlu0 %148 }
  0xd9   :  { %v199_v17 = vpop.f32.mrb[0].mxu0 }
  0xda   :  { %v113_v18 = vpop.f32.mrb[1].mxu0  ;;  %v122_v19 = vadd.f32 %v199_v17, %v46_v14 }
  0xdb   :  { %v114_v20 = vadd.f32 %v113_v18, %v36_v13  ;;  %v200_v21 = vpop.f32.mrb[2].mxu0 }
  0xdc   :  { %v116_v23 = vpop.f32.mrb[3].mxu0  ;;  %v125_v25 = vadd.f32 %v200_v21, %v51_v16  ;;  %v130_v28 = vmax.f32 %v122_v19, 0.0 }
  0xdd   :  { %v128_v24 = vmax.f32 %v114_v20, 0.0  ;;  %v117_v26 = vadd.f32 %v116_v23, %v41_v15 }
  0xde   :  { %v131_v31 = vmax.f32 %v125_v25, 0.0  ;;  %v158_v34 = vmul.f32 %v149_v33, %v130_v28 }
  0xdf   :  { %v129_v29 = vmax.f32 %v117_v26, 0.0  ;;  %v156_v30 = vmul.f32 %v139_v22, %v128_v24 }
  0xe0   :  { %v159_v37 = vmul.f32 %v154_v36, %v131_v31 }
  0xe1   :  { %v157_v32 = vmul.f32 %v144_v27, %v129_v29 }
  0xe3   :  { %v160_v35 = vadd.f32 %v157_v32, %v156_v30 }
  0xe5   :  { %v161_v38 = vadd.f32 %v160_v35, %v158_v34 }
  0xe7   :  { %v162_v39 = vadd.f32 %v161_v38, %v159_v37 }
  0xe9   :  { %v163_v40 = vrot.slane %v162_v39, 4 }
  0xeb   :  { %v164_v41 = vadd.f32 %v163_v40, %v162_v39 }
  0xed   :  { %v165_v42 = vrot.slane %v164_v41, 2 }
  0xef   :  { %v166_v43 = vadd.f32 %v165_v42, %v164_v41 }
  0xf1   :  { %v167_v44 = vrot.slane %v166_v43, 1 }
  0xf3   :  { %v168_v46 = vadd.f32 %v167_v44, %v166_v43 }
  0xf5   :  { %v171_v47 = vadd.f32 %v170_v45, %v168_v46 }
  0xf7   :  { %172 = vst [vmem:[#allocation3] sm:$0x1] %v171_v47 }
  0xf8   :  { %220 = shalt.err (!%p217_p4)
}
  0xf9   :  { %s221_s19 = scalar_lea.hbm %s318_s5, 16 }
  0xfa   :  { %p222_p5 = scmp.ne.s32.totalorder %s318_s5, %s221_s19  ;;  %p225_p6 = scmp.lt.u32.totalorder %s221_s19, %s318_s5 }
  0xfc   :  { %p227_p7 = pnand %p225_p6, %p222_p5 }
  0xfe   :  { %230 = shalt.err (!%p227_p7)
}
  0xff   :  { %182 = dma.vmem_to_hbm [thread:$0]  %s180_s14, 16, %s318_s5, [#allocation4]  }
 0x100   :  { %231 = dma.done.wait [#allocation4], 16  }
 0x101   :  { %232 = vsyncadd [#allocation4], 4294967280 }
 0x102   :  { %186 = vsyncpa [#allocation4], 1 }

</bundles_post_ra>
